<compile_context>
chip_gen: v7x
topology: tpu7x:2x2x1
jax: 0.10.0
libtpu: 0.0.40
codegen_flags: <defaults>
</compile_context>

<pallas_src>
import jax
import jax.numpy as jnp
from jax.experimental import pallas as pl
from jax.experimental.pallas import tpu as pltpu

LANE = 128
SUBLANE = 8
_GRANULE = SUBLANE * LANE                 # minimal (8,128) pad granule
_TARGET_BLOCK_BYTES = 2 * 1024 * 1024     # ~2 MiB per block (4x pipelined = 8 MiB)
_VMEM_LIMIT_BYTES = 32 * 1024 * 1024      # <= default/physical on all generations


def _mish_kernel(x_ref, o_ref):
    x = x_ref[...].astype(jnp.float32)
    # Single EUP exp; branch-free overflow-safe rational form of tanh(softplus).
    u = jnp.exp(-jnp.abs(x))
    pos = x > 0.0
    two_u = 2.0 * u
    u_sq = u * u
    num = jnp.where(pos, 1.0 + two_u, u_sq + two_u)
    den = num + jnp.where(pos, 2.0 * u_sq, 2.0)
    tanh_sp = num * pl.reciprocal(den, approx=False)
    o_ref[...] = (x * tanh_sp).astype(o_ref.dtype)


def _choose_lane_width(n: int):
    """Largest lane-dense width (multiple of 128) dividing n, or None."""
    for w in (4096, 2048, 1024, 512, 256, 128):
        if n % w == 0:
            return w
    return None


def mish(x: jax.Array) -> jax.Array:
    """Elementwise Mish; accepts any shape (e.g. NCHW), returns same shape/dtype."""
    orig_shape = x.shape
    dtype = x.dtype
    n = x.size
    if n == 0:
        return x

    flat = jnp.ravel(x)

    width = _choose_lane_width(n)
    if width is None:
        # Ragged element count: pad only to the minimal 8x128 granule.
        n_pad = ((n + _GRANULE - 1) // _GRANULE) * _GRANULE
        flat = jnp.pad(flat, (0, n_pad - n))
        width = _choose_lane_width(n_pad)
    else:
        n_pad = n

    rows = n_pad // width
    itemsize = jnp.dtype(dtype).itemsize

    # Block rows: target ~_TARGET_BLOCK_BYTES, multiple of 8.
    block_rows = max(SUBLANE,
                     (_TARGET_BLOCK_BYTES // (width * itemsize)) // SUBLANE * SUBLANE)
    # Keep >= ~8 grid steps when the array is large enough (v7x megacore +
    # pipeline ramp); never below 8 rows.
    steps_cap = max(SUBLANE, ((rows + 7) // 8) // SUBLANE * SUBLANE)
    block_rows = min(block_rows, steps_cap)
    if rows <= block_rows:
        block_rows = rows  # single block; full-extent row dim is always legal

    grid = (pl.cdiv(rows, block_rows),)

    out2d = pl.pallas_call(
        _mish_kernel,
        out_shape=jax.ShapeDtypeStruct((rows, width), dtype),
        grid_spec=pltpu.PrefetchScalarGridSpec(
            num_scalar_prefetch=0,
            grid=grid,
            in_specs=[pl.BlockSpec((block_rows, width), lambda i: (i, 0))],
            out_specs=pl.BlockSpec((block_rows, width), lambda i: (i, 0)),
        ),
        compiler_params=pltpu.CompilerParams(
            dimension_semantics=("parallel",),
            vmem_limit_bytes=_VMEM_LIMIT_BYTES,
        ),
    )(flat.reshape(rows, width))

    out_flat = out2d.reshape(-1)
    if n_pad != n:
        out_flat = out_flat[:n]
    return out_flat.reshape(orig_shape)


def _mish_reference(x):
    xf = x.astype(jnp.float32)
    return (xf * jnp.tanh(jax.nn.softplus(xf))).astype(x.dtype)


if __name__ == "__main__":
    key = jax.random.PRNGKey(0)

    # Primary small NCHW case matching typical conv-net usage of Mish.
    x = jax.random.normal(key, (2, 4, 16, 16), dtype=jnp.float32) * 3.0
    y = jax.block_until_ready(mish(x))
    y_ref = _mish_reference(x)
    assert y.shape == x.shape and y.dtype == x.dtype
    assert jnp.allclose(y, y_ref, atol=1e-5, rtol=1e-5), "f32 NCHW mismatch"

    k1, k2 = jax.random.split(key)

    # Ragged (non-multiple-of-128) element count -> exercises the pad path.
    x2 = jax.random.normal(k1, (3, 5, 7, 11), dtype=jnp.float32) * 4.0
    y2 = jax.block_until_ready(mish(x2))
    assert jnp.allclose(y2, _mish_reference(x2), atol=1e-5, rtol=1e-5), "ragged mismatch"

    # Multi-block grid + bf16 dtype.
    x3 = (jax.random.normal(k2, (8, 64, 32, 32), dtype=jnp.float32) * 2.0).astype(jnp.bfloat16)
    y3 = jax.block_until_ready(mish(x3))
    assert y3.dtype == jnp.bfloat16
    assert jnp.allclose(y3.astype(jnp.float32),
                        _mish_reference(x3).astype(jnp.float32),
                        atol=2e-2, rtol=2e-2), "bf16 mismatch"

    # Wide-range numerical check for the single-exp reformulation (+/-100).
    x4 = jnp.linspace(-100.0, 100.0, 4096, dtype=jnp.float32).reshape(8, 512)
    y4 = jax.block_until_ready(mish(x4))
    assert jnp.allclose(y4, _mish_reference(x4), atol=1e-5, rtol=1e-5), "wide-range mismatch"

    print("KERNEL_OK")
</pallas_src>

<mosaic_0001>
module attributes {stable_mosaic.version = 11 : i64} {
  func.func @_mish_kernel(%arg0: i32, %arg1: memref<1x2048xf32, #tpu.memory_space<vmem>>, %arg2: memref<1x2048xf32, #tpu.memory_space<vmem>>) attributes {dimension_semantics = [#tpu.dimension_semantics<parallel>], iteration_bounds = array<i64: 1>, scalar_prefetch = 0 : i64, scratch_operands = 0 : i64, tpu.core_type = #tpu.core_type<tc>, window_params = [{transform_indices = @transform_0, window_bounds = array<i64: 1, 2048>}, {transform_indices = @transform_1, window_bounds = array<i64: 1, 2048>}]} {
    %c0 = arith.constant 0 : index
    %c0_0 = arith.constant 0 : index
    %0 = vector.load %arg1[%c0, %c0_0] : memref<1x2048xf32, #tpu.memory_space<vmem>>, vector<1x2048xf32>
    %1 = math.absf %0 : vector<1x2048xf32>
    %cst = arith.constant 0.000000e+00 : f32
    %2 = vector.broadcast %cst : f32 to vector<1x2048xf32>
    %3 = arith.subf %2, %1 : vector<1x2048xf32>
    %4 = math.exp %3 : vector<1x2048xf32>
    %cst_1 = arith.constant 0.000000e+00 : f32
    %5 = vector.broadcast %cst_1 : f32 to vector<1x2048xf32>
    %6 = arith.cmpf ogt, %0, %5 : vector<1x2048xf32>
    %cst_2 = arith.constant 2.000000e+00 : f32
    %7 = vector.broadcast %cst_2 : f32 to vector<1x2048xf32>
    %8 = arith.mulf %7, %4 : vector<1x2048xf32>
    %9 = arith.mulf %4, %4 : vector<1x2048xf32>
    %cst_3 = arith.constant 1.000000e+00 : f32
    %10 = vector.broadcast %cst_3 : f32 to vector<1x2048xf32>
    %11 = arith.addf %10, %8 : vector<1x2048xf32>
    %12 = arith.addf %9, %8 : vector<1x2048xf32>
    %13 = arith.select %6, %11, %12 : vector<1x2048xi1>, vector<1x2048xf32>
    %cst_4 = arith.constant 2.000000e+00 : f32
    %14 = vector.broadcast %cst_4 : f32 to vector<1x2048xf32>
    %15 = arith.mulf %14, %9 : vector<1x2048xf32>
    %cst_5 = arith.constant 2.000000e+00 : f32
    %16 = vector.broadcast %cst_5 : f32 to vector<1x2048xf32>
    %17 = arith.select %6, %15, %16 : vector<1x2048xi1>, vector<1x2048xf32>
    %18 = arith.addf %13, %17 : vector<1x2048xf32>
    %19 = tpu.reciprocal %18 : vector<1x2048xf32> -> vector<1x2048xf32>
    %20 = arith.mulf %13, %19 : vector<1x2048xf32>
    %21 = arith.mulf %0, %20 : vector<1x2048xf32>
    %c0_6 = arith.constant 0 : index
    %c0_7 = arith.constant 0 : index
    %22 = vector.load %arg2[%c0_6, %c0_7] : memref<1x2048xf32, #tpu.memory_space<vmem>>, vector<1x2048xf32>
    tpu.vector_store %arg2[%c0_6, %c0_7], %21 {strides = array<i32>} : memref<1x2048xf32, #tpu.memory_space<vmem>>, vector<1x2048xf32>,
    return
  }
  func.func @transform_0(%arg0: i32) -> (i32, i32) {
    %c0_i32 = arith.constant 0 : i32
    %c0_i32_0 = arith.constant 0 : i32
    return %arg0, %c0_i32 : i32, i32
  }
  func.func @transform_1(%arg0: i32) -> (i32, i32) {
    %c0_i32 = arith.constant 0 : i32
    %c0_i32_0 = arith.constant 0 : i32
    return %arg0, %c0_i32 : i32, i32
  }
}

</mosaic_0001>

<bundles_post_ra>
// kernel: tpu_custom_call.1
= control target key start
LH: loop header
LB: loop body
LE: loop exit
PB: predicated region body
PF: predicated region fallthrough
CT: control target
= control target key end

     0   :  { %6 = vsyncpa [#allocation3], 0  ;;  %s166_s0 = inlined_call_operand.hbm [shape: f32[1,2048], index: 0, kind: input, shape index: {}]   ;;  %s167_s1 = inlined_call_operand.hbm [shape: f32[1,2048], index: 1, kind: output, shape index: {}]  }
   0x1   :  { %7 = vsyncpa [#allocation4], 0  ;;  %s130_s6 = smov [#allocation2]   ;;  %s82_s10 = scalar_lea.hbm %s166_s0, 256 }
   0x2   :  { %s14_s7 = sshll.u32 %s130_s6, 4  ;;  %p83_p0 = scmp.ne.s32.totalorder %s166_s0, %s82_s10  ;;  %s15_s7 = int_to_ptr.vmem [resolvable:$true] %s14_s7 }
   0x3   :  { %p86_p1 = scmp.lt.u32.totalorder %s82_s10, %s166_s0 }
   0x5   :  { %p88_p2 = pnand %p86_p1, %p83_p0 }
   0x7   :  { %91 = shalt.err (!%p88_p2)
}
   0x8   :  { %s92_s15 = scalar_lea.vmem %s15_s7, 256  ;;  %p97_p4 = scmp.lt.s32.totalorder %s15_s7, %s15_s7 }
   0x9   :  { %p93_p3 = scmp.ne.s32.totalorder %s15_s7, %s92_s15  ;;  %p98_p5 = scmp.lt.s32.totalorder %s92_s15, %s92_s15 }
   0xb   :  { %p99_p6 = por %p98_p5, %p97_p4 }
   0xd   :  { %p100_p7 = pnand %p99_p6, %p93_p3 }
   0xf   :  { %103 = shalt.err (!%p100_p7)
}
  0x10   :  { %17 = dma.hbm_to_vmem [thread:$0]  %s166_s0, 256, %s15_s7, [#allocation3]  }
  0x11   :  { %126 = dma.done.wait [#allocation3], 256  }
  0x12   :  { %127 = vsyncadd [#allocation3], 4294967040  ;;  %v21_v0 = vld [vmem:[#allocation2] sm:$0xff]  ;;  %v22_v1 = vld [vmem:[#allocation2 + $0x8] sm:$0xff]  ;;  %s131_s0 = smov [#allocation5]  }
  0x13   :  { %v23_v2 = vand.u32 2147483647, %v21_v0  ;;  %v24_v3 = vand.u32 2147483647, %v22_v1  ;;  %vm31_vm0 = vcmp.gt.f32.partialorder %v21_v0, 0.0  ;;  %vm32_vm1 = vcmp.gt.f32.partialorder %v22_v1, 0.0 }
  0x14   :  { %s63_s18 = sshll.u32 %s131_s0, 4  ;;  %s64_s18 = int_to_ptr.vmem [resolvable:$true] %s63_s18 }
  0x15   :  { %v25_v4 = vsub.f32 0.0, %v23_v2  ;;  %v26_v5 = vsub.f32 0.0, %v24_v3  ;;  %s104_s19 = scalar_lea.vmem %s64_s18, 256  ;;  %p109_p9 = scmp.lt.s32.totalorder %s64_s18, %s64_s18 }
  0x16   :  { %p105_p8 = scmp.ne.s32.totalorder %s64_s18, %s104_s19  ;;  %p110_p10 = scmp.lt.s32.totalorder %s104_s19, %s104_s19 }
  0x17   :  { %v27_v6 = vmul.f32 1.442695, %v25_v4  ;;  %v29_v7 = vmul.f32 1.442695, %v26_v5 }
  0x18   :  { %p111_p11 = por %p110_p10, %p109_p9 }
  0x19   :  { %74 = vpow2.f32 %v27_v6 }
  0x1a   :  { %76 = vpow2.f32 %v29_v7  ;;  %p112_p12 = pnand %p111_p11, %p105_p8 }
  0x23   :  { %v75_v8 = vpop.eup %74 }
  0x24   :  { %v77_v9 = vpop.eup %76  ;;  %v33_v10 = vmul.f32 2.0, %v75_v8  ;;  %v35_v11 = vmul.f32 %v75_v8, %v75_v8 }
  0x25   :  { %v34_v12 = vmul.f32 2.0, %v77_v9  ;;  %v36_v13 = vmul.f32 %v77_v9, %v77_v9 }
  0x26   :  { %v37_v14 = vadd.f32 1.0, %v33_v10  ;;  %v39_v15 = vadd.f32 %v35_v11, %v33_v10  ;;  %v43_v16 = vmul.f32 2.0, %v35_v11 }
  0x27   :  { %v38_v17 = vadd.f32 1.0, %v34_v12  ;;  %v40_v18 = vadd.f32 %v36_v13, %v34_v12  ;;  %v44_v19 = vmul.f32 2.0, %v36_v13 }
  0x28   :  { %v41_v20 = vsel %vm31_vm0, %v37_v14, %v39_v15  ;;  %v45_v21 = vsel %vm31_vm0, %v43_v16, 2.0 }
  0x29   :  { %v47_v22 = vadd.f32 %v45_v21, %v41_v20  ;;  %v42_v23 = vsel %vm32_vm1, %v38_v17, %v40_v18  ;;  %v46_v24 = vsel %vm32_vm1, %v44_v19, 2.0 }
  0x2a   :  { %v48_v25 = vadd.f32 %v46_v24, %v42_v23 }
  0x2b   :  { %78 = vrcp.f32 %v47_v22 }
  0x2c   :  { %80 = vrcp.f32 %v48_v25 }
  0x35   :  { %v79_v26 = vpop.eup %78 }
  0x36   :  { %v81_v27 = vpop.eup %80  ;;  %v51_v28 = vmul.f32 %v79_v26, %v41_v20 }
  0x37   :  { %v52_v29 = vmul.f32 %v81_v27, %v42_v23 }
  0x38   :  { %v53_v30 = vmul.f32 %v51_v28, %v21_v0 }
  0x39   :  { %v54_v31 = vmul.f32 %v52_v29, %v22_v1 }
  0x3a   :  { %55 = vst [vmem:[#allocation5] sm:$0xff] %v53_v30 }
  0x3b   :  { %56 = vst [vmem:[#allocation5 + $0x8] sm:$0xff] %v54_v31 }
  0x3c   :  { %115 = shalt.err (!%p112_p12)
}
  0x3d   :  { %s116_s22 = scalar_lea.hbm %s167_s1, 256 }
  0x3e   :  { %p117_p13 = scmp.ne.s32.totalorder %s167_s1, %s116_s22  ;;  %p120_p0 = scmp.lt.u32.totalorder %s116_s22, %s167_s1 }
  0x40   :  { %p122_p1 = pnand %p120_p0, %p117_p13 }
  0x42   :  { %125 = shalt.err (!%p122_p1)
}
  0x43   :  { %66 = dma.vmem_to_hbm [thread:$0]  %s64_s18, 256, %s167_s1, [#allocation4]  }
  0x44   :  { %128 = dma.done.wait [#allocation4], 256  }
  0x45   :  { %129 = vsyncadd [#allocation4], 4294967040 }
  0x46   :  { %70 = vsyncpa [#allocation3], 1 }
  0x47   :  { %71 = vsyncpa [#allocation4], 1 }

</bundles_post_ra>
